<compile_context>
chip_gen: v7x
topology: tpu7x:2x2x1
jax: 0.10.0
libtpu: 0.0.40
codegen_flags: <defaults>
</compile_context>

<pallas_src>
import jax
import jax.numpy as jnp
from jax.experimental import pallas as pl
from jax.experimental.pallas import tpu as pltpu


def _round_up(x, m):
    return ((x + m - 1) // m) * m


# ---------------------------------------------------------------------------
# Kernel
# ---------------------------------------------------------------------------
def smu_kernel(h_ref, s_ref, w0h_ref, w0s_ref, b0_ref,
               w1_ref, b1_ref, w2_ref, b2_ref,
               out_ref, z0_ref, acc_ref):
    j = pl.program_id(1)

    # --- j == 0: layer 0 over the full (padded) feature width ---------------
    # torch.cat([h, s], -1) @ W0 is computed as two accumulated MXU dots, so
    # no concatenated activation buffer ever touches HBM.
    @pl.when(j == 0)
    def _():
        z = jnp.dot(h_ref[...], w0h_ref[...], preferred_element_type=jnp.float32)
        z = z + jnp.dot(s_ref[...], w0s_ref[...], preferred_element_type=jnp.float32)
        z = jnp.maximum(z + b0_ref[...], 0.0)                  # ReLU (f32)
        z0_ref[...] = z.astype(jnp.bfloat16)                   # resident activations
        acc_ref[...] = jnp.zeros_like(acc_ref)

    # --- every j: one h_pad slab of layers 1 and 2 ---------------------------
    # z1_slab = relu(z0 @ W1[:, slab] + b1[slab]);  acc += z1_slab @ W2[slab, :]
    # (ReLU is elementwise, so the sum over column slabs equals the unsplit
    #  layer-1 -> layer-2 product; zero-padded lanes stay exactly 0.)
    z1 = jnp.maximum(
        jnp.dot(z0_ref[...], w1_ref[...], preferred_element_type=jnp.float32)
        + b1_ref[...], 0.0)
    acc_ref[...] += jnp.dot(z1.astype(jnp.bfloat16), w2_ref[...],
                            preferred_element_type=jnp.float32)

    # --- last j: bias + tanh + gated combine, lane-dense store ---------------
    @pl.when(j == pl.num_programs(1) - 1)
    def _():
        z = jnp.tanh(acc_ref[...] + b2_ref[...])               # (tm, d_pad) f32
        h = h_ref[...].astype(jnp.float32)
        s = s_ref[...].astype(jnp.float32)
        # Rows past B (when B % tm != 0) carry unspecified data, but rows are
        # independent and the store is masked, so the result is unaffected.
        out_ref[...] = ((1.0 - z) * h + z * s).astype(out_ref.dtype)


# ---------------------------------------------------------------------------
# Parameter packing (pad to 128 lanes, split W0, cast weights to bf16)
# ---------------------------------------------------------------------------
def prepare_params(params):
    """Pad the f32 MLP params to lane-dense (multiple-of-128) shapes, split W0
    into its h / s halves, and cast weights to bf16 for the MXU.  Biases stay
    f32 (added to the f32 accumulator)."""
    W0, b0, W1, b1, W2, b2 = params            # W stored (in, out)
    d_in = W0.shape[0] // 2
    h_dim = W0.shape[1]
    d_pad = _round_up(d_in, 128)
    h_pad = _round_up(h_dim, 128)

    W0h = jnp.zeros((d_pad, h_pad), jnp.float32).at[:d_in, :h_dim].set(W0[:d_in])
    W0s = jnp.zeros((d_pad, h_pad), jnp.float32).at[:d_in, :h_dim].set(W0[d_in:])
    W1p = jnp.zeros((h_pad, h_pad), jnp.float32).at[:h_dim, :h_dim].set(W1)
    W2p = jnp.zeros((h_pad, d_pad), jnp.float32).at[:h_dim, :d_in].set(W2)
    b0p = jnp.zeros((1, h_pad), jnp.float32).at[:, :h_dim].set(b0)
    b1p = jnp.zeros((1, h_pad), jnp.float32).at[:, :h_dim].set(b1)
    b2p = jnp.zeros((1, d_pad), jnp.float32).at[:, :d_in].set(b2)

    return (W0h.astype(jnp.bfloat16), W0s.astype(jnp.bfloat16), b0p,
            W1p.astype(jnp.bfloat16), b1p,
            W2p.astype(jnp.bfloat16), b2p)


# ---------------------------------------------------------------------------
# Pallas wrapper
# ---------------------------------------------------------------------------
def smu_layer_pallas(h_l, s_l, packed, *, tm=None, tn1=None,
                     out_dtype=jnp.float32):
    """Pallas SMULayer forward.  h_l, s_l: (B, d_in).  out_dtype=bf16 halves
    the output write stream if the consumer accepts it."""
    W0h, W0s, b0, W1, b1, W2, b2 = packed
    B, d_in = h_l.shape
    d_pad, h_pad = W0h.shape
    out_bytes = jnp.dtype(out_dtype).itemsize

    # Wrapper-side layout plumbing (single cheap fused pass): cast activations
    # to bf16 and zero-pad features to 128 lanes.  Pad is a no-op when d_in is
    # already a multiple of 128.  No concat — layer 0 is two accumulated dots.
    hp = jnp.pad(h_l.astype(jnp.bfloat16), ((0, 0), (0, d_pad - d_in)))
    sp = jnp.pad(s_l.astype(jnp.bfloat16), ((0, 0), (0, d_pad - d_in)))

    # Row tile: >= 2 grid steps whenever B allows (v7x has 2 TensorCores and a
    # grid of 1 also disables input/output pipelining), <= 512 rows, 8-aligned.
    tm_auto = tm is None
    if tm_auto:
        tm = B if B <= 8 else min(512, _round_up(pl.cdiv(B, 2), 8))

    # Layer-1/2 slab width: must divide h_pad so no out-of-range weight
    # columns ever enter the accumulation (h_pad is always 128-aligned).
    if tn1 is None:
        tn1 = 512 if h_pad % 512 == 0 else (256 if h_pad % 256 == 0 else 128)
        tn1 = min(tn1, h_pad)
    assert h_pad % tn1 == 0, "tn1 must divide the padded hidden width"
    nj = h_pad // tn1

    def _vmem_need(rows):
        return (2 * 2 * rows * d_pad * 2          # h, s tiles (bf16, double-buffered)
                + 2 * rows * d_pad * out_bytes    # out tile (double-buffered)
                + 2 * d_pad * h_pad * 2           # W0_h + W0_s (single-buffered)
                + (h_pad + d_pad) * 4             # b0, b2 (single-buffered)
                + 2 * h_pad * tn1 * 2             # W1 slab (double-buffered)
                + 2 * tn1 * 4                     # b1 slab (double-buffered)
                + 2 * tn1 * d_pad * 2             # W2 slab (double-buffered)
                + rows * h_pad * 2                # z0 scratch (bf16)
                + rows * d_pad * 4                # layer-2 accumulator (f32)
                + rows * max(h_pad, tn1) * 4)     # in-flight f32 intermediates

    # Keep the request <= 48 MiB: leaves headroom on v7x (64 MiB / TensorCore)
    # and shrinks the row tile instead of spilling.
    VMEM_BUDGET = 48 << 20
    if tm_auto:
        while tm > 256 and _vmem_need(tm) > VMEM_BUDGET:
            tm = max(256, _round_up(tm // 2, 8))
    vmem_limit = int(min(max(2 * _vmem_need(tm), 8 << 20), VMEM_BUDGET))

    grid = (pl.cdiv(B, tm), nj)

    act_spec = pl.BlockSpec((tm, d_pad), lambda i, j: (i, 0))
    # Constant across the whole grid -> single-buffered (no wasted 2nd buffer).
    const = lambda shape: pl.BlockSpec(shape, lambda i, j: (0, 0),
                                       pipeline_mode=pl.Buffered(1))

    flops = 2 * B * (2 * d_pad * h_pad + h_pad * h_pad + h_pad * d_pad)
    bytes_accessed = ((hp.size + sp.size) * 2 + B * d_pad * out_bytes
                      + (W0h.size + W0s.size + W1.size + W2.size) * 2
                      + (b0.size + b1.size + b2.size) * 4)

    out = pl.pallas_call(
        smu_kernel,
        out_shape=jax.ShapeDtypeStruct((B, d_pad), out_dtype),
        grid=grid,
        in_specs=[
            act_spec,                                           # h  (bf16)
            act_spec,                                           # s  (bf16)
            const((d_pad, h_pad)),                              # W0_h (bf16, resident)
            const((d_pad, h_pad)),                              # W0_s (bf16, resident)
            const((1, h_pad)),                                  # b0   (f32, resident)
            pl.BlockSpec((h_pad, tn1), lambda i, j: (0, j)),    # W1 column slab
            pl.BlockSpec((1, tn1), lambda i, j: (0, j)),        # b1 slab
            pl.BlockSpec((tn1, d_pad), lambda i, j: (j, 0)),    # W2 row slab
            const((1, d_pad)),                                  # b2   (f32, resident)
        ],
        out_specs=pl.BlockSpec((tm, d_pad), lambda i, j: (i, 0)),
        scratch_shapes=[
            pltpu.VMEM((tm, h_pad), jnp.bfloat16),              # layer-0 activations
            pltpu.VMEM((tm, d_pad), jnp.float32),               # layer-2 accumulator
        ],
        compiler_params=pltpu.CompilerParams(
            dimension_semantics=("parallel", "arbitrary"),
            vmem_limit_bytes=vmem_limit),
        cost_estimate=pl.CostEstimate(
            flops=flops, transcendentals=B * d_pad,
            bytes_accessed=bytes_accessed),
    )(hp, sp, W0h, W0s, b0, W1, b1, W2, b2)

    return out[:, :d_in]


def _smu_xla(h_l, s_l, packed):
    """Plain fused XLA dot chain — wins at tiny shapes where >90% of the
    padded 128-lane Pallas tiles are dead and per-step overhead dominates."""
    W0h, W0s, b0, W1, b1, W2, b2 = packed
    d_in = h_l.shape[-1]
    h = h_l.astype(jnp.float32)
    s = s_l.astype(jnp.float32)
    z = jax.nn.relu(h @ W0h[:d_in].astype(jnp.float32)
                    + s @ W0s[:d_in].astype(jnp.float32) + b0)
    z = jax.nn.relu(z @ W1.astype(jnp.float32) + b1)
    z = jnp.tanh(z @ W2.astype(jnp.float32) + b2)[:, :d_in]
    return (1.0 - z) * h + z * s


def smu_layer(h_l, s_l, packed, *, force_pallas=False, **kwargs):
    """Size-gated entry point: the Pallas path only pays off once the 128-lane
    tiles are actually filled and B is large enough to amortize grid-step
    overhead; otherwise fall back to the XLA fusion."""
    B, d_in = h_l.shape
    if not force_pallas and (B < 1024 or d_in < 128):
        return _smu_xla(h_l, s_l, packed)
    return smu_layer_pallas(h_l, s_l, packed, **kwargs)


# ---------------------------------------------------------------------------
# Reference + init
# ---------------------------------------------------------------------------
def make_params(key, l_nums, h_dim, d_in):
    """Deterministic init of the l_nums-layer MLP (here l_nums=3), f32,
    weights stored (in, out) so the forward is x @ W + b."""
    assert l_nums == 3, "this script instantiates the module with l_nums=3"
    k0, k1, k2, k3, k4, k5 = jax.random.split(key, 6)
    scale = 0.1
    W0 = scale * jax.random.normal(k0, (2 * d_in, h_dim), jnp.float32)
    b0 = scale * jax.random.normal(k1, (1, h_dim), jnp.float32)
    W1 = scale * jax.random.normal(k2, (h_dim, h_dim), jnp.float32)
    b1 = scale * jax.random.normal(k3, (1, h_dim), jnp.float32)
    W2 = scale * jax.random.normal(k4, (h_dim, d_in), jnp.float32)
    b2 = scale * jax.random.normal(k5, (1, d_in), jnp.float32)
    return (W0, b0, W1, b1, W2, b2)


def smu_reference(h_l, s_l, params):
    """Pure-JAX f32 reference matching the PyTorch forward exactly."""
    W0, b0, W1, b1, W2, b2 = params
    z = jnp.concatenate([h_l, s_l], axis=-1)
    z = jax.nn.relu(z @ W0 + b0)
    z = jax.nn.relu(z @ W1 + b1)
    z = jnp.tanh(z @ W2 + b2)
    return (1.0 - z) * h_l + z * s_l


if __name__ == "__main__":
    l_nums, h_dim, d_in = 3, 32, 16
    B = 16

    key = jax.random.PRNGKey(0)
    kh, ks, kp = jax.random.split(key, 3)
    h_l = jax.random.normal(kh, (B, d_in), jnp.float32)
    s_l = jax.random.normal(ks, (B, d_in), jnp.float32)

    params = make_params(kp, l_nums, h_dim, d_in)     # f32, original layout
    packed = prepare_params(params)                   # padded, split W0, bf16 weights

    ref = smu_reference(h_l, s_l, params)

    # Force the Pallas path at demo shapes so the kernel is actually exercised
    # (at these sizes the size gate would otherwise route to the XLA fusion).
    out = smu_layer(h_l, s_l, packed, force_pallas=True)
    out = jax.block_until_ready(out)
    assert out.shape == ref.shape
    # bf16 activation streaming + bf16 MXU with f32 accumulation -> small drift.
    assert jnp.allclose(out, ref, atol=2e-2, rtol=2e-2), "pallas mismatch vs reference"

    # Sanity-check the size-gated fallback path too.
    out_gate = smu_layer(h_l, s_l, packed)
    assert jnp.allclose(out_gate, ref, atol=2e-2, rtol=2e-2), "fallback mismatch"

    print("KERNEL_OK")
</pallas_src>

<mosaic_0001>
module attributes {stable_mosaic.version = 11 : i64} {
  func.func @smu_kernel(%arg0: i32, %arg1: i32, %arg2: memref<8x128xbf16, #tpu.memory_space<vmem>>, %arg3: memref<8x128xbf16, #tpu.memory_space<vmem>>, %arg4: memref<128x128xbf16, #tpu.memory_space<vmem>>, %arg5: memref<128x128xbf16, #tpu.memory_space<vmem>>, %arg6: memref<1x128xf32, #tpu.memory_space<vmem>>, %arg7: memref<128x128xbf16, #tpu.memory_space<vmem>>, %arg8: memref<1x128xf32, #tpu.memory_space<vmem>>, %arg9: memref<128x128xbf16, #tpu.memory_space<vmem>>, %arg10: memref<1x128xf32, #tpu.memory_space<vmem>>, %arg11: memref<8x128xf32, #tpu.memory_space<vmem>>, %arg12: memref<8x128xbf16, #tpu.memory_space<vmem>>, %arg13: memref<8x128xf32, #tpu.memory_space<vmem>>) attributes {dimension_semantics = [#tpu.dimension_semantics<parallel>, #tpu.dimension_semantics<arbitrary>], iteration_bounds = array<i64: 2, 1>, scalar_prefetch = 0 : i64, scratch_operands = 2 : i64, tpu.core_type = #tpu.core_type<tc>, window_params = [{transform_indices = @transform_0, window_bounds = array<i64: 8, 128>}, {transform_indices = @transform_1, window_bounds = array<i64: 8, 128>}, {pipeline_mode = #tpu.pipeline_mode<synchronous>, transform_indices = @transform_2, window_bounds = array<i64: 128, 128>}, {pipeline_mode = #tpu.pipeline_mode<synchronous>, transform_indices = @transform_3, window_bounds = array<i64: 128, 128>}, {pipeline_mode = #tpu.pipeline_mode<synchronous>, transform_indices = @transform_4, window_bounds = array<i64: 1, 128>}, {transform_indices = @transform_5, window_bounds = array<i64: 128, 128>}, {transform_indices = @transform_6, window_bounds = array<i64: 1, 128>}, {transform_indices = @transform_7, window_bounds = array<i64: 128, 128>}, {pipeline_mode = #tpu.pipeline_mode<synchronous>, transform_indices = @transform_8, window_bounds = array<i64: 1, 128>}, {transform_indices = @transform_9, window_bounds = array<i64: 8, 128>}]} {
    %c0_i32 = arith.constant 0 : i32
    %0 = arith.cmpi eq, %arg1, %c0_i32 : i32
    %1 = arith.extui %0 : i1 to i32
    %c0_i32_0 = arith.constant 0 : i32
    %2 = arith.cmpi ne, %1, %c0_i32_0 : i32
    scf.if %2 {
      %c0_16 = arith.constant 0 : index
      %c0_17 = arith.constant 0 : index
      %20 = vector.load %arg2[%c0_16, %c0_17] : memref<8x128xbf16, #tpu.memory_space<vmem>>, vector<8x128xbf16>
      %c0_18 = arith.constant 0 : index
      %c0_19 = arith.constant 0 : index
      %21 = vector.load %arg4[%c0_18, %c0_19] : memref<128x128xbf16, #tpu.memory_space<vmem>>, vector<128x128xbf16>
      %cst_20 = arith.constant dense<0.000000e+00> : vector<8x128xf32>
      %22 = tpu.matmul %20, %21, %cst_20 {dimension_numbers = #tpu.dot_dimension_numbers<[1], [0], [0], [1], [0, 0, 1, 1], [], []>} : vector<8x128xbf16>, vector<128x128xbf16>, vector<8x128xf32> -> vector<8x128xf32>
      %c0_21 = arith.constant 0 : index
      %c0_22 = arith.constant 0 : index
      %23 = vector.load %arg3[%c0_21, %c0_22] : memref<8x128xbf16, #tpu.memory_space<vmem>>, vector<8x128xbf16>
      %c0_23 = arith.constant 0 : index
      %c0_24 = arith.constant 0 : index
      %24 = vector.load %arg5[%c0_23, %c0_24] : memref<128x128xbf16, #tpu.memory_space<vmem>>, vector<128x128xbf16>
      %cst_25 = arith.constant dense<0.000000e+00> : vector<8x128xf32>
      %25 = tpu.matmul %23, %24, %cst_25 {dimension_numbers = #tpu.dot_dimension_numbers<[1], [0], [0], [1], [0, 0, 1, 1], [], []>} : vector<8x128xbf16>, vector<128x128xbf16>, vector<8x128xf32> -> vector<8x128xf32>
      %26 = arith.addf %22, %25 : vector<8x128xf32>
      %c0_26 = arith.constant 0 : index
      %c0_27 = arith.constant 0 : index
      %27 = vector.load %arg6[%c0_26, %c0_27] : memref<1x128xf32, #tpu.memory_space<vmem>>, vector<1x128xf32>
      %28 = vector.broadcast %27 : vector<1x128xf32> to vector<8x128xf32>
      %29 = arith.addf %26, %28 : vector<8x128xf32>
      %cst_28 = arith.constant 0.000000e+00 : f32
      %30 = vector.broadcast %cst_28 : f32 to vector<8x128xf32>
      %31 = arith.maximumf %29, %30 : vector<8x128xf32>
      %32 = arith.truncf %31 : vector<8x128xf32> to vector<8x128xbf16>
      %c0_29 = arith.constant 0 : index
      %c0_30 = arith.constant 0 : index
      %33 = vector.load %arg12[%c0_29, %c0_30] : memref<8x128xbf16, #tpu.memory_space<vmem>>, vector<8x128xbf16>
      tpu.vector_store %arg12[%c0_29, %c0_30], %32 {strides = array<i32>} : memref<8x128xbf16, #tpu.memory_space<vmem>>, vector<8x128xbf16>,
      %cst_31 = arith.constant 0.000000e+00 : f32
      %34 = vector.broadcast %cst_31 : f32 to vector<8x128xf32>
      %c0_32 = arith.constant 0 : index
      %c0_33 = arith.constant 0 : index
      %35 = vector.load %arg13[%c0_32, %c0_33] : memref<8x128xf32, #tpu.memory_space<vmem>>, vector<8x128xf32>
      tpu.vector_store %arg13[%c0_32, %c0_33], %34 {strides = array<i32>} : memref<8x128xf32, #tpu.memory_space<vmem>>, vector<8x128xf32>,
    } else {
    }
    %c0 = arith.constant 0 : index
    %c0_1 = arith.constant 0 : index
    %3 = vector.load %arg12[%c0, %c0_1] : memref<8x128xbf16, #tpu.memory_space<vmem>>, vector<8x128xbf16>
    %c0_2 = arith.constant 0 : index
    %c0_3 = arith.constant 0 : index
    %4 = vector.load %arg7[%c0_2, %c0_3] : memref<128x128xbf16, #tpu.memory_space<vmem>>, vector<128x128xbf16>
    %cst = arith.constant dense<0.000000e+00> : vector<8x128xf32>
    %5 = tpu.matmul %3, %4, %cst {dimension_numbers = #tpu.dot_dimension_numbers<[1], [0], [0], [1], [0, 0, 1, 1], [], []>} : vector<8x128xbf16>, vector<128x128xbf16>, vector<8x128xf32> -> vector<8x128xf32>
    %c0_4 = arith.constant 0 : index
    %c0_5 = arith.constant 0 : index
    %6 = vector.load %arg8[%c0_4, %c0_5] : memref<1x128xf32, #tpu.memory_space<vmem>>, vector<1x128xf32>
    %7 = vector.broadcast %6 : vector<1x128xf32> to vector<8x128xf32>
    %8 = arith.addf %5, %7 : vector<8x128xf32>
    %cst_6 = arith.constant 0.000000e+00 : f32
    %9 = vector.broadcast %cst_6 : f32 to vector<8x128xf32>
    %10 = arith.maximumf %8, %9 : vector<8x128xf32>
    %c0_7 = arith.constant 0 : index
    %c0_8 = arith.constant 0 : index
    %11 = vector.load %arg13[%c0_7, %c0_8] : memref<8x128xf32, #tpu.memory_space<vmem>>, vector<8x128xf32>
    %12 = arith.truncf %10 : vector<8x128xf32> to vector<8x128xbf16>
    %c0_9 = arith.constant 0 : index
    %c0_10 = arith.constant 0 : index
    %13 = vector.load %arg9[%c0_9, %c0_10] : memref<128x128xbf16, #tpu.memory_space<vmem>>, vector<128x128xbf16>
    %cst_11 = arith.constant dense<0.000000e+00> : vector<8x128xf32>
    %14 = tpu.matmul %12, %13, %cst_11 {dimension_numbers = #tpu.dot_dimension_numbers<[1], [0], [0], [1], [0, 0, 1, 1], [], []>} : vector<8x128xbf16>, vector<128x128xbf16>, vector<8x128xf32> -> vector<8x128xf32>
    %15 = arith.addf %11, %14 : vector<8x128xf32>
    %c0_12 = arith.constant 0 : index
    %c0_13 = arith.constant 0 : index
    %16 = vector.load %arg13[%c0_12, %c0_13] : memref<8x128xf32, #tpu.memory_space<vmem>>, vector<8x128xf32>
    tpu.vector_store %arg13[%c0_12, %c0_13], %15 {strides = array<i32>} : memref<8x128xf32, #tpu.memory_space<vmem>>, vector<8x128xf32>,
    %c0_i32_14 = arith.constant 0 : i32
    %17 = arith.cmpi eq, %arg1, %c0_i32_14 : i32
    %18 = arith.extui %17 : i1 to i32
    %c0_i32_15 = arith.constant 0 : i32
    %19 = arith.cmpi ne, %18, %c0_i32_15 : i32
    scf.if %19 {
      %c0_16 = arith.constant 0 : index
      %c0_17 = arith.constant 0 : index
      %20 = vector.load %arg13[%c0_16, %c0_17] : memref<8x128xf32, #tpu.memory_space<vmem>>, vector<8x128xf32>
      %c0_18 = arith.constant 0 : index
      %c0_19 = arith.constant 0 : index
      %21 = vector.load %arg10[%c0_18, %c0_19] : memref<1x128xf32, #tpu.memory_space<vmem>>, vector<1x128xf32>
      %22 = vector.broadcast %21 : vector<1x128xf32> to vector<8x128xf32>
      %23 = arith.addf %20, %22 : vector<8x128xf32>
      %24 = math.tanh %23 : vector<8x128xf32>
      %c0_20 = arith.constant 0 : index
      %c0_21 = arith.constant 0 : index
      %25 = vector.load %arg2[%c0_20, %c0_21] : memref<8x128xbf16, #tpu.memory_space<vmem>>, vector<8x128xbf16>
      %26 = arith.extf %25 : vector<8x128xbf16> to vector<8x128xf32>
      %c0_22 = arith.constant 0 : index
      %c0_23 = arith.constant 0 : index
      %27 = vector.load %arg3[%c0_22, %c0_23] : memref<8x128xbf16, #tpu.memory_space<vmem>>, vector<8x128xbf16>
      %28 = arith.extf %27 : vector<8x128xbf16> to vector<8x128xf32>
      %cst_24 = arith.constant 1.000000e+00 : f32
      %29 = vector.broadcast %cst_24 : f32 to vector<8x128xf32>
      %30 = arith.subf %29, %24 : vector<8x128xf32>
      %31 = arith.mulf %30, %26 : vector<8x128xf32>
      %32 = arith.mulf %24, %28 : vector<8x128xf32>
      %33 = arith.addf %31, %32 : vector<8x128xf32>
      %c0_25 = arith.constant 0 : index
      %c0_26 = arith.constant 0 : index
      %34 = vector.load %arg11[%c0_25, %c0_26] : memref<8x128xf32, #tpu.memory_space<vmem>>, vector<8x128xf32>
      tpu.vector_store %arg11[%c0_25, %c0_26], %33 {strides = array<i32>} : memref<8x128xf32, #tpu.memory_space<vmem>>, vector<8x128xf32>,
    } else {
    }
    return
  }
  func.func @transform_0(%arg0: i32, %arg1: i32) -> (i32, i32) {
    %c0_i32 = arith.constant 0 : i32
    %c0_i32_0 = arith.constant 0 : i32
    return %arg0, %c0_i32 : i32, i32
  }
  func.func @transform_1(%arg0: i32, %arg1: i32) -> (i32, i32) {
    %c0_i32 = arith.constant 0 : i32
    %c0_i32_0 = arith.constant 0 : i32
    return %arg0, %c0_i32 : i32, i32
  }
  func.func @transform_2(%arg0: i32, %arg1: i32) -> (i32, i32) {
    %c0_i32 = arith.constant 0 : i32
    %c0_i32_0 = arith.constant 0 : i32
    %c0_i32_1 = arith.constant 0 : i32
    return %c0_i32, %c0_i32_0 : i32, i32
  }
  func.func @transform_3(%arg0: i32, %arg1: i32) -> (i32, i32) {
    %c0_i32 = arith.constant 0 : i32
    %c0_i32_0 = arith.constant 0 : i32
    %c0_i32_1 = arith.constant 0 : i32
    return %c0_i32, %c0_i32_0 : i32, i32
  }
  func.func @transform_4(%arg0: i32, %arg1: i32) -> (i32, i32) {
    %c0_i32 = arith.constant 0 : i32
    %c0_i32_0 = arith.constant 0 : i32
    %c0_i32_1 = arith.constant 0 : i32
    return %c0_i32, %c0_i32_0 : i32, i32
  }
  func.func @transform_5(%arg0: i32, %arg1: i32) -> (i32, i32) {
    %c0_i32 = arith.constant 0 : i32
    %c0_i32_0 = arith.constant 0 : i32
    return %c0_i32, %arg1 : i32, i32
  }
  func.func @transform_6(%arg0: i32, %arg1: i32) -> (i32, i32) {
    %c0_i32 = arith.constant 0 : i32
    %c0_i32_0 = arith.constant 0 : i32
    return %c0_i32, %arg1 : i32, i32
  }
  func.func @transform_7(%arg0: i32, %arg1: i32) -> (i32, i32) {
    %c0_i32 = arith.constant 0 : i32
    %c0_i32_0 = arith.constant 0 : i32
    return %arg1, %c0_i32 : i32, i32
  }
  func.func @transform_8(%arg0: i32, %arg1: i32) -> (i32, i32) {
    %c0_i32 = arith.constant 0 : i32
    %c0_i32_0 = arith.constant 0 : i32
    %c0_i32_1 = arith.constant 0 : i32
    return %c0_i32, %c0_i32_0 : i32, i32
  }
  func.func @transform_9(%arg0: i32, %arg1: i32) -> (i32, i32) {
    %c0_i32 = arith.constant 0 : i32
    %c0_i32_0 = arith.constant 0 : i32
    return %arg0, %c0_i32 : i32, i32
  }
}

</mosaic_0001>

<bundles_post_ra>
// kernel: tpu_custom_call.1
= control target key start
LH: loop header
LB: loop body
LE: loop exit
PB: predicated region body
PF: predicated region fallthrough
CT: control target
= control target key end

     0   :  { %s2178_s0 = inlined_call_operand.hbm [shape: bf16[16,128], index: 0, kind: input, shape index: {}]   ;;  %s2179_s1 = inlined_call_operand.hbm [shape: bf16[16,128], index: 1, kind: input, shape index: {}]   ;;  %s2180_s2 = inlined_call_operand.hbm [shape: bf16[128,128], index: 2, kind: input, shape index: {}]   ;;  %s2181_s3 = inlined_call_operand.hbm [shape: bf16[128,128], index: 3, kind: input, shape index: {}]   ;;  %s2182_s4 = inlined_call_operand.vmem [shape: f32[1,128], index: 4, kind: input, shape index: {}]   ;;  %s2183_s5 = inlined_call_operand.hbm [shape: bf16[128,128], index: 5, kind: input, shape index: {}]   ;;  %s2184_s6 = inlined_call_operand.vmem [shape: f32[1,128], index: 6, kind: input, shape index: {}]   ;;  %s2185_s7 = inlined_call_operand.hbm [shape: bf16[128,128], index: 7, kind: input, shape index: {}]   ;;  %s2186_s8 = inlined_call_operand.vmem [shape: f32[1,128], index: 8, kind: input, shape index: {}]   ;;  %s2187_s9 = inlined_call_operand.hbm [shape: f32[16,128], index: 9, kind: output, shape index: {}]  }
   0x1   :  { %2194 = sst [smem:[#allocation24_spill]] %s2180_s2 }
   0x2   :  { %2195 = sst [smem:[#allocation25_spill]] %s2181_s3 }
   0x3   :  { %2196 = sst [smem:[#allocation26_spill]] %s2183_s5 }
   0x4   :  { %2197 = sst [smem:[#allocation27_spill]] %s2185_s7 }
   0x5   :  { %2198 = sst [smem:[#allocation28_spill]] %s2186_s8 }
   0x6   :  { %2199 = sst [smem:[#allocation29_spill]] %s2187_s9 }
   0x7   :  { %14 = vsyncpa [#allocation5], 0 }
   0x8   :  { %16 = vsyncpa [#allocation5 + $0x1], 0 }
   0x9   :  { %17 = vsyncpa [#allocation8], 0 }
   0xa   :  { %19 = vsyncpa [#allocation8 + $0x1], 0 }
   0xb   :  { %20 = vsyncpa [#allocation11], 0 }
   0xc   :  { %21 = vsyncpa [#allocation14], 0 }
   0xd   :  { %22 = vsyncpa [#allocation6], 0 }
   0xe   :  { %24 = vsyncpa [#allocation6 + $0x1], 0  ;;  %s1779_s30 = smov 0   ;;  %s1781_s10 = smov 0  }
   0xf   :  { %s1783_s11 = smov 0   ;;  %s1785_s12 = smov 0  }
  0x10   :  { %s1787_s13 = smov 0   ;;  %s1789_s14 = smov 0  }
  0x11 LB: > { %2200 = sst [smem:[#allocation22_spill]] %s1708_s12  ;;  %s1810_s15 = sadd.s32 4294967295, %s1716_s14   ;;  %s1716_s14 = sphi %s1789_s14, %s30_s14   ;;  %s1712_s13 = sphi %s1787_s13, %s2234_s13   ;;  %s1708_s12 = sphi %s1785_s12, %s2233_s12   ;;  %s1704_s11 = sphi %s1783_s11, %s2232_s11   ;;  %s1700_s10 = sphi %s1781_s10, %s2231_s10   ;;  %s1696_s30 = sphi %s1779_s30, %s2230_s30  }
  0x12   : > { %p1126_p0 = scmp.ge.s32.totalorder %s1716_s14, 1  ;;  %p2189_p1 = scmp.eq.s32.totalorder %s1810_s15, 0 }
  0x13   : > { %p287_p2 = scmp.lt.s32.totalorder %s1716_s14, 3  ;;  %s1718_s17 = smov [#allocation9]  }
  0x14   : > { %s299_s18 = sshll.u32 %s1718_s17, 4  ;;  %s1719_s20 = smov [#allocation10]   ;;  %s1819_s18 = int_to_ptr.vmem [resolvable:$true] %s299_s18 }
  0x15   : > { %p1815_p3 = pnand %p1126_p0, %p287_p2  ;;  %s312_s21 = sshll.u32 %s1719_s20, 4  ;;  %s1830_s21 = int_to_ptr.vmem [resolvable:$true] %s312_s21 }
  0x16   : > { %s1720_s22 = smov [#allocation12]   ;;  %s2203_s2 = sld [smem:[#allocation24_spill]] }
  0x17   : > { %s2201_s16 = scalar_select %p1815_p3, 1, 0 }
  0x18   : > { %p1322_p4 = pneg %p1815_p3  ;;  %s1832_s23 = sshll.u32 %s1720_s22, 4  ;;  %s331_s23 = int_to_ptr.vmem [resolvable:$true] %s1832_s23 }
  0x1a   : > { %p1826_p6 = pnand %p1322_p4, %p2189_p1 }
  0x1c   : > { %s1446_s26 = scalar_lea.hbm %s2203_s2, 1024  ;;  %p1842_p8 = pneg %p1826_p6 }
  0x1d   : > { %p1447_p7 = scmp.ne.s32.totalorder %s2203_s2, %s1446_s26  ;;  %p1453_p11 = scmp.lt.u32.totalorder %s1446_s26, %s2203_s2 }
  0x1f   : > { %p1449_p9 = pnand %p1842_p8, %p1447_p7 }
  0x21   : > { %p1450_p10 = pneg %p1449_p9 }
  0x23   : > { %p1455_p12 = pnand %p1453_p11, %p1450_p10 }
  0x25   : > { %1458 = shalt.err (!%p1455_p12)
}
  0x26   : > { %s1459_s22 = scalar_lea.vmem %s1819_s18, 1024  ;;  %p1467_p4 = scmp.lt.s32.totalorder %s1819_s18, %s1819_s18 }
  0x27   : > { %p1460_p13 = scmp.ne.s32.totalorder %s1819_s18, %s1459_s22  ;;  %p1468_p5 = scmp.lt.s32.totalorder %s1459_s22, %s1459_s22 }
  0x29   : > { %p1462_p0 = pnand %p1460_p13, %p1842_p8  ;;  %p1469_p7 = por %p1468_p5, %p1467_p4 }
  0x2b   : > { %p1463_p2 = pneg %p1462_p0 }
  0x2d   : > { %p1470_p9 = pnand %p1469_p7, %p1463_p2 }
  0x2f   : > { %1473 = shalt.err (!%p1470_p9)
}
  0x30   : > { %s1721_s24 = smov 64   ;;  %s1722_s25 = smov 4  }
  0x31   : > { %1325 = dma.hbm_to_vmem [thread:$0]  (!%p1826_p6), %s2203_s2, 1024, %s1819_s18, [#allocation8], %s1721_s24, %s1721_s24, %s1722_s25  }
  0x32   : > { %s2205_s3 = sld [smem:[#allocation25_spill]] }
  0x38   : > { %s1474_s20 = scalar_lea.hbm %s2205_s3, 1024 }
  0x39   : > { %p1475_p5 = scmp.ne.s32.totalorder %s2205_s3, %s1474_s20  ;;  %p1481_p12 = scmp.lt.u32.totalorder %s1474_s20, %s2205_s3 }
  0x3b   : > { %p1477_p10 = pnand %p1475_p5, %p1842_p8 }
  0x3d   : > { %p1478_p11 = pneg %p1477_p10 }
  0x3f   : > { %p1483_p13 = pnand %p1481_p12, %p1478_p11 }
  0x41   : > { %1486 = shalt.err (!%p1483_p13)
}
  0x42   : > { %s1487_s18 = scalar_lea.vmem %s1830_s21, 1024  ;;  %p1495_p7 = scmp.lt.s32.totalorder %s1830_s21, %s1830_s21 }
  0x43   : > { %p1488_p0 = scmp.ne.s32.totalorder %s1830_s21, %s1487_s18  ;;  %p1496_p9 = scmp.lt.s32.totalorder %s1487_s18, %s1487_s18 }
  0x45   : > { %p1490_p2 = pnand %p1488_p0, %p1842_p8  ;;  %p1497_p5 = por %p1496_p9, %p1495_p7 }
  0x47   : > { %p1491_p4 = pneg %p1490_p2 }
  0x49   : > { %p1498_p10 = pnand %p1497_p5, %p1491_p4 }
  0x4b   : > { %1501 = shalt.err (!%p1498_p10)
}
  0x4c   : > { %1328 = dma.hbm_to_vmem [thread:$0]  (!%p1826_p6), %s2205_s3, 1024, %s1830_s21, [#allocation11], %s1721_s24, %s1721_s24, %s1722_s25  }
  0x4d   : > { %s2206_s5 = sld [smem:[#allocation26_spill]] }
  0x53   : > { %s1502_s27 = scalar_lea.hbm %s2206_s5, 1024 }
  0x54   : > { %p1503_p11 = scmp.ne.s32.totalorder %s2206_s5, %s1502_s27  ;;  %p1509_p0 = scmp.lt.u32.totalorder %s1502_s27, %s2206_s5 }
  0x56   : > { %p1505_p12 = pnand %p1503_p11, %p1842_p8 }
  0x58   : > { %p1506_p13 = pneg %p1505_p12 }
  0x5a   : > { %p1511_p2 = pnand %p1509_p0, %p1506_p13 }
  0x5c   : > { %1514 = shalt.err (!%p1511_p2)
}
  0x5d   : > { %s1515_s18 = scalar_lea.vmem %s331_s23, 1024  ;;  %p1523_p5 = scmp.lt.s32.totalorder %s331_s23, %s331_s23 }
  0x5e   : > { %p1516_p4 = scmp.ne.s32.totalorder %s331_s23, %s1515_s18  ;;  %p1524_p10 = scmp.lt.s32.totalorder %s1515_s18, %s1515_s18 }
  0x60   : > { %p1518_p7 = pnand %p1516_p4, %p1842_p8  ;;  %p1525_p1 = por %p1524_p10, %p1523_p5 }
  0x62   : > { %p1519_p9 = pneg %p1518_p7 }
  0x64   : > { %p1526_p3 = pnand %p1525_p1, %p1519_p9 }
  0x66   : > { %1529 = shalt.err (!%p1526_p3)
}
  0x67   : > { %1331 = dma.hbm_to_vmem [thread:$0]  (!%p1826_p6), %s2206_s5, 1024, %s331_s23, [#allocation11], %s1721_s24, %s1721_s24, %s1722_s25  }
  0x68   : > { %s1723_s9 = smov [#allocation13]   ;;  %s2207_s7 = sld [smem:[#allocation27_spill]] }
  0x69   : > { %s352_s12 = sshll.u32 %s1723_s9, 4  ;;  %s353_s12 = int_to_ptr.vmem [resolvable:$true] %s352_s12 }
  0x6e   : > { %s1530_s28 = scalar_lea.hbm %s2207_s7, 1024 }
  0x6f   : > { %p1531_p1 = scmp.ne.s32.totalorder %s2207_s7, %s1530_s28  ;;  %p1537_p12 = scmp.lt.u32.totalorder %s1530_s28, %s2207_s7 }
  0x71   : > { %p1533_p3 = pnand %p1531_p1, %p1842_p8 }
  0x73   : > { %p1534_p11 = pneg %p1533_p3 }
  0x75   : > { %p1539_p13 = pnand %p1537_p12, %p1534_p11 }
  0x77   : > { %1542 = shalt.err (!%p1539_p13)
}
  0x78   : > { %s1543_s23 = scalar_lea.vmem %s353_s12, 1024  ;;  %p1551_p7 = scmp.lt.s32.totalorder %s353_s12, %s353_s12 }
  0x79   : > { %p1544_p0 = scmp.ne.s32.totalorder %s353_s12, %s1543_s23  ;;  %p1552_p9 = scmp.lt.s32.totalorder %s1543_s23, %s1543_s23 }
  0x7b   : > { %p1546_p2 = pnand %p1544_p0, %p1842_p8  ;;  %p1553_p5 = por %p1552_p9, %p1551_p7 }
  0x7d   : > { %p1547_p4 = pneg %p1546_p2 }
  0x7f   : > { %p1554_p10 = pnand %p1553_p5, %p1547_p4 }
  0x81   : > { %1557 = shalt.err (!%p1554_p10)
}
  0x82   : > { %1334 = dma.hbm_to_vmem [thread:$0]  (!%p1826_p6), %s2207_s7, 1024, %s353_s12, [#allocation14], %s1721_s24, %s1721_s24, %s1722_s25  }
  0x83   : > { %s1125_s19 = sadd.s32 4294967294, %s1716_s14   ;;  %s42_s29 = sadd.s32 1, %s1712_s13 }
  0x84   : > { %p44_p8 = scmp.ge.s32.totalorder %s42_s29, 2  ;;  %s49_s9 = sadd.s32 1, %s1704_s11 }
  0x85   : > { %p56_p1 = scmp.ne.s32.totalorder %s1704_s11, %s1700_s10  ;;  %p57_p3 = scmp.eq.s32.totalorder %s1716_s14, 0 }
  0x86   : > { %s2236_s29 = smov (%p44_p8, %s42_s29), 0  ;;  %p62_p12 = scmp.ne.s32.totalorder %s1700_s10, %s1696_s30 }
  0x87   : > { %2208 = sst [smem:[#allocation23_spill]] %s2236_s29  ;;  %p1943_p11 = por %p57_p3, %p56_p1 }
  0x88   : > { %s46_s24 = ssub.s32 %s1712_s13, %s2236_s29  ;;  %p274_p6 = scmp.eq.s32.totalorder %s1810_s15, 1 }
  0x89   : > { %p47_p13 = scmp.eq.s32.totalorder %s46_s24, 0  ;;  %p2210_p0 = scmp.eq.s32.totalorder %s1810_s15, 0 }
  0x8a   : > { %p1958_p4 = por %p274_p6, %p56_p1  ;;  %p280_p7 = scmp.eq.s32.totalorder %s1125_s19, 1 }
  0x8b   : > { %p1954_p2 = por %p2210_p0, %p62_p12  ;;  %p1350_p5 = scmp.lt.s32.totalorder %s1716_s14, 2 }
  0x8c   : > { %s2212_s12 = scalar_select %p1958_p4, 1, 0 }
  0x8d   : > { %s2211_s25 = scalar_select %p1954_p2, 1, 0 }
  0x8e   : > { %s1963_s27 = scalar_select %p47_p13, %s1704_s11, %s49_s9  }
  0x8f   : > { %p1965_p9 = por %p280_p7, %p62_p12  ;;  %s369_s17 = sand.u32 1, %s1704_s11  }
  0x90   : > { %s1134_s20 = sshll.u32 %s1712_s13, 6  ;;  %s1972_s22 = sshll.u32 %s369_s17, 2 }
  0x91   : > { %s2213_s28 = scalar_select %p1965_p9, 1, 0 }
  0x92   : > { %s1977_s21 = scalar_lea.hbm %s2178_s0, %s1134_s20  ;;  %s373_s8 = scalar_lea.vmem [#allocation4], %s1972_s22 }
  0x93   : > { %s380_s19 = sshll.u32 %s373_s8, 4  ;;  %p1982_p10 = pnand %p1350_p5, %p1943_p11  ;;  %s1986_s19 = int_to_ptr.vmem [resolvable:$true] %s380_s19 }
  0x94   : > { %s1991_s23 = scalar_lea.hbm %s2179_s1, %s1134_s20  ;;  %s370_s2 = scalar_lea.sflag [#allocation5], %s369_s17 }
  0x95   : > { %s1558_s3 = scalar_lea.hbm %s1977_s21, 64  ;;  %p1560_p1 = pneg %p1982_p10 }
  0x96   : > { %p1559_p8 = scmp.ne.s32.totalorder %s1977_s21, %s1558_s3  ;;  %s1563_s5 = scalar_lea.hbm %s2178_s0, 128 }
  0x97   : > { %p1564_p12 = scmp.lt.u32.totalorder %s1977_s21, %s2178_s0  ;;  %p1565_p6 = scmp.lt.u32.totalorder %s1563_s5, %s1558_s3 }
  0x98   : > { %p1561_p3 = pnand %p1560_p1, %p1559_p8  ;;  %p1567_p0 = scmp.lt.u32.totalorder %s1558_s3, %s1977_s21 }
  0x99   : > { %p1566_p13 = por %p1565_p6, %p1564_p12 }
  0x9a   : > { %p1562_p11 = pneg %p1561_p3 }
  0x9b   : > { %p1568_p7 = por %p1567_p0, %p1566_p13 }
  0x9d   : > { %p1569_p5 = pnand %p1568_p7, %p1562_p11 }
  0x9f   : > { %1572 = shalt.err (!%p1569_p5)
}
  0xa0   : > { %s1573_s17 = scalar_lea.vmem %s1986_s19, 64  ;;  %s1724_s20 = smov [#allocation4]  }
  0xa1   : > { %p1574_p8 = scmp.ne.s32.totalorder %s1986_s19, %s1573_s17  ;;  %s1578_s24 = sshll.u32 %s1724_s20, 4  ;;  %s1579_s24 = int_to_ptr.vmem [resolvable:$false] %s1578_s24 }
  0xa2   : > { %s1580_s7 = scalar_lea.vmem %s1579_s24, 128  ;;  %p1581_p4 = scmp.lt.s32.totalorder %s1986_s19, %s1579_s24 }
  0xa3   : > { %p1576_p3 = pnand %p1574_p8, %p1560_p1  ;;  %p1582_p12 = scmp.lt.s32.totalorder %s1580_s7, %s1573_s17 }
  0xa5   : > { %p1577_p9 = pneg %p1576_p3  ;;  %p1583_p6 = por %p1582_p12, %p1581_p4 }
  0xa7   : > { %p1584_p13 = pnand %p1583_p6, %p1577_p9 }
  0xa9   : > { %1587 = shalt.err (!%p1584_p13)
}
  0xaa   : > { %1338 = dma.hbm_to_vmem [thread:$0]  (!%p1982_p10), %s1977_s21, 64, %s1986_s19, %s370_s2  }
  0xab   : > { %s387_s3 = sand.u32 1, %s1716_s14   ;;  %s391_s5 = scalar_lea.vmem [#allocation7], %s1972_s22 }
  0xac   : > { %s398_s29 = sshll.u32 %s391_s5, 4  ;;  %s388_s18 = scalar_lea.sflag [#allocation8], %s387_s3  ;;  %s399_s29 = int_to_ptr.vmem [resolvable:$true] %s398_s29 }
  0xad   : > { %s1588_s26 = scalar_lea.hbm %s1991_s23, 64  ;;  %s1593_s20 = scalar_lea.hbm %s2179_s1, 128 }
  0xae   : > { %p1589_p4 = scmp.ne.s32.totalorder %s1991_s23, %s1588_s26  ;;  %p1594_p0 = scmp.lt.u32.totalorder %s1991_s23, %s2179_s1 }
  0xaf   : > { %p1595_p7 = scmp.lt.u32.totalorder %s1593_s20, %s1588_s26  ;;  %p1597_p8 = scmp.lt.u32.totalorder %s1588_s26, %s1991_s23 }
  0xb0   : > { %p1591_p9 = pnand %p1589_p4, %p1560_p1 }
  0xb1   : > { %p1596_p5 = por %p1595_p7, %p1594_p0 }
  0xb2   : > { %p1592_p11 = pneg %p1591_p9 }
  0xb3   : > { %p1598_p3 = por %p1597_p8, %p1596_p5 }
  0xb5   : > { %p1599_p12 = pnand %p1598_p3, %p1592_p11 }
  0xb7   : > { %1602 = shalt.err (!%p1599_p12)
}
  0xb8   : > { %s1603_s2 = scalar_lea.vmem %s399_s29, 64  ;;  %s1725_s22 = smov [#allocation7]  }
  0xb9   : > { %p1604_p6 = scmp.ne.s32.totalorder %s399_s29, %s1603_s2  ;;  %s1608_s21 = sshll.u32 %s1725_s22, 4  ;;  %s1609_s21 = int_to_ptr.vmem [resolvable:$false] %s1608_s21 }
  0xba   : > { %s1610_s19 = scalar_lea.vmem %s1609_s21, 128  ;;  %p1611_p9 = scmp.lt.s32.totalorder %s399_s29, %s1609_s21 }
  0xbb   : > { %p1606_p13 = pnand %p1604_p6, %p1560_p1  ;;  %p1612_p2 = scmp.lt.s32.totalorder %s1610_s19, %s1603_s2 }
  0xbd   : > { %p1607_p4 = pneg %p1606_p13  ;;  %p1613_p0 = por %p1612_p2, %p1611_p9 }
  0xbf   : > { %p1614_p7 = pnand %p1613_p0, %p1607_p4 }
  0xc1   : > { %1617 = shalt.err (!%p1614_p7)
}
  0xc2   : > { %1341 = dma.hbm_to_vmem [thread:$0]  (!%p1982_p10), %s1991_s23, 64, %s399_s29, %s388_s18  }
  0xc3   : > { %p2215_p11 = scmp.ne.s32.totalorder %s2201_s16, 0 }
  0xc4   : > { %s2042_s3 = sand.u32 (!%p2215_p11), 1, %s1700_s10   ;;  %p2216_p2 = scmp.ne.s32.totalorder (!%p2215_p11), %s2211_s25, 0 }
  0xc5   : > { %407 = sbr.rel (%p2215_p11) target bundleno = 943 (0x3af), region = 56  ;;  %s1138_s5 = sshll.u32 (!%p2215_p11), %s2042_s3, 2 }
  0xc6   : > { %s410_s26 = scalar_lea.sflag (!%p2215_p11), [#allocation5], %s2042_s3  ;;  %s2046_s8 = scalar_lea.vmem (!%p2215_p11), [#allocation4], %s1138_s5 }
  0xcc   : > { %1671 = dma.done.wait (%p2216_p2), %s410_s26, 64  }
  0xcd   : > { %1673 = vsyncadd (%p2216_p2), %s410_s26, 4294967232  ;;  %s418_s9 = sand.u32 1, %s1810_s15   ;;  %s2053_s23 = scalar_lea.vmem [#allocation7], %s1138_s5 }
  0xce   : > { %s419_s16 = scalar_lea.sflag [#allocation8], %s418_s9 }
  0xcf   : > { %1675 = dma.done.wait (%p2216_p2), %s419_s16, 64  }
  0xd0   : > { %1677 = vsyncadd (%p2216_p2), %s419_s16, 4294967232  ;;  %p2217_p10 = scmp.eq.s32.totalorder %s1810_s15, 0 }
  0xd2   : > { %1679 = dma.done.wait (%p2217_p10), [#allocation8], 1024   ;;  %p2218_p1 = pmov %p2217_p10 }
  0xd4   : > { %1681 = vsyncadd (%p2218_p1), [#allocation8], 4294966272  ;;  %p2219_p5 = pmov %p2218_p1 }
  0xd5   : > { %p2220_p8 = pmov %p2218_p1 }
  0xd6   : > { %1683 = dma.done.wait (%p2219_p5), [#allocation11], 2048  }
  0xd7   : > { %1685 = vsyncadd (%p2220_p8), [#allocation11], 4294965248  ;;  %p2221_p3 = pmov %p2218_p1 }
  0xd8   : > { %p2222_p12 = pmov %p2218_p1 }
  0xd9   : > { %1687 = dma.done.wait (%p2221_p3), [#allocation14], 1024  }
  0xda   : > { %1689 = vsyncadd (%p2222_p12), [#allocation14], 4294966272  ;;  %v1726_v0 = vmov 0.0   ;;  %vm1727_vm0 = vmmov 0   ;;  %v1412_v1 = vld [vmem:[#allocation10] sm:$0xff]   ;;  %v1414_v3 = vld [vmem:[#allocation10 + $0x8] sm:$0xff]  }
  0xdb   : > { %1220 = vmatprep.subr.bf16.mxu0 %v1726_v0  ;;  %1240 = vmatprep.subr.bf16.mxu1 %v1726_v0  ;;  %v1413_v2 = vld [vmem:[#allocation9] sm:$0xff]   ;;  %v1415_v4 = vld [vmem:[#allocation9 + $0x8] sm:$0xff]   ;;  %v1416_v5 = vld [vmem:[#allocation10 + $0x10] sm:$0xff]   ;;  %s2223_s17 = sld [smem:[#allocation22_spill]]  ;;  %s2224_s7 = sld [smem:[#allocation28_spill]] }
  0xdc   : > { %1236 = vmatprep.mubr.msk.bf16.mxu0 %vm1727_vm0, %v1726_v0  ;;  %1256 = vmatprep.mubr.msk.bf16.mxu1 %vm1727_vm0, %v1726_v0  ;;  %v1417_v6 = vld [vmem:[#allocation9 + $0x10] sm:$0xff]   ;;  %v1418_v7 = vld [vmem:[#allocation10 + $0x18] sm:$0xff]   ;;  %v1420_v9 = vld [vmem:[#allocation10 + $0x20] sm:$0xff]   ;;  %s1144_s2 = sshll.u32 %s2042_s3, 3  ;;  %s2225_s9 = sld [smem:[#allocation29_spill]] }
  0xdd   : > { %1221 = vmatpush3.bf16.msra.mxu0 %v1412_v1  ;;  %1241 = vmatpush3.bf16.msra.mxu1 %v1413_v2  ;;  %v1419_v8 = vld [vmem:[#allocation9 + $0x18] sm:$0xff]   ;;  %v1421_v10 = vld [vmem:[#allocation9 + $0x20] sm:$0xff]   ;;  %v1422_v11 = vld [vmem:[#allocation10 + $0x28] sm:$0xff]   ;;  %s480_s21 = scalar_lea.vmem [#allocation15], %s1144_s2  ;;  %p2226_p13 = scmp.ne.s32.totalorder %s2212_s12, 0 }
  0xde   : > { %1222 = vmatprep.subr.bf16.mxu0 %v1726_v0  ;;  %1242 = vmatprep.subr.bf16.mxu1 %v1726_v0  ;;  %v1423_v12 = vld [vmem:[#allocation9 + $0x28] sm:$0xff]   ;;  %v1424_v13 = vld [vmem:[#allocation10 + $0x30] sm:$0xff]   ;;  %v1426_v15 = vld [vmem:[#allocation10 + $0x38] sm:$0xff]   ;;  %s969_s19 = sshll.u32 %s480_s21, 4  ;;  %s1728_s15 = smov [#allocation15]   ;;  %s2131_s19 = int_to_ptr.vmem [resolvable:$true] %s969_s19 }
  0xdf   : > { %v1425_v14 = vld [vmem:[#allocation9 + $0x30] sm:$0xff]   ;;  %v1427_v16 = vld [vmem:[#allocation9 + $0x38] sm:$0xff]   ;;  %v1428_v18 = vld [vmem:[#allocation12] sm:$0xff]   ;;  %s1622_s25 = sshll.u32 %s1728_s15, 4  ;;  %s1623_s25 = int_to_ptr.vmem [resolvable:$false] %s1622_s25 }
  0xe0   : > { %v507_v17 = vld [vmem:[%s2053_s23] sm:$0xf]  ;;  %v490_v19 = vld [vmem:[%s2046_s8] sm:$0xf]  ;;  %v1429_v20 = vld [vmem:[#allocation12 + $0x8] sm:$0xff]   ;;  %s1624_s29 = scalar_lea.vmem %s1623_s25, 256  ;;  %p1625_p0 = scmp.lt.s32.totalorder %s2131_s19, %s1623_s25 }
  0xe1   : > { %1223 = vmatpush3.bf16.msra.mxu0 %v1414_v3  ;;  %1243 = vmatpush3.bf16.msra.mxu1 %v1415_v4  ;;  %v1430_v21 = vld [vmem:[#allocation12 + $0x10] sm:$0xff]   ;;  %v1431_v22 = vld [vmem:[#allocation12 + $0x18] sm:$0xff]   ;;  %v1432_v23 = vld [vmem:[#allocation12 + $0x20] sm:$0xff]   ;;  %s1181_s22 = sshll.u32 %s2223_s17, 7 }
  0xe2   : > { %1224 = vmatprep.subr.bf16.mxu0 %v1726_v0  ;;  %1244 = vmatprep.subr.bf16.mxu1 %v1726_v0  ;;  %v1433_v24 = vld [vmem:[#allocation12 + $0x28] sm:$0xff]   ;;  %v1434_v25 = vld [vmem:[#allocation12 + $0x30] sm:$0xff]   ;;  %v1435_v26 = vld [vmem:[#allocation12 + $0x38] sm:$0xff]   ;;  %s2129_s16 = scalar_lea.hbm %s2225_s9, %s1181_s22 }
  0xe3   : > { %v1436_v27 = vld [vmem:[#allocation13] sm:$0xff]   ;;  %v1437_v28 = vld [vmem:[#allocation13 + $0x8] sm:$0xff]   ;;  %v1438_v29 = vld [vmem:[#allocation13 + $0x10] sm:$0xff]  }
  0xe4   : > { %v1439_v30 = vld [vmem:[#allocation13 + $0x18] sm:$0xff]   ;;  %v1440_v31 = vld [vmem:[#allocation13 + $0x20] sm:$0xff]   ;;  %v1441_v32 = vld [vmem:[#allocation13 + $0x28] sm:$0xff]  }
  0xe5   : > { %1225 = vmatpush3.bf16.msra.mxu0 %v1416_v5  ;;  %1245 = vmatpush3.bf16.msra.mxu1 %v1417_v6  ;;  %v1161_v35 = vld [vmem:[%s2182_s4] ss:$0 sm:$0xff]  ;;  %v1442_v47 = vld [vmem:[#allocation13 + $0x30] sm:$0xff]   ;;  %v1443_v48 = vld [vmem:[#allocation13 + $0x38] sm:$0xff]  }
  0xe6   : > { %1226 = vmatprep.subr.bf16.mxu0 %v1726_v0  ;;  %1246 = vmatprep.subr.bf16.mxu1 %v1726_v0  ;;  %v1162_v49 = vld [vmem:[%s2184_s6] ss:$0 sm:$0xff]  ;;  %v948_v63 = vld [vmem:[%s2053_s23] sm:$0xf]  ;;  %s1618_s23 = scalar_lea.vmem %s2131_s19, 128 }
  0xe7   : > { %v1179_v57 = vld [vmem:[%s2224_s7] ss:$0 sm:$0xff]  ;;  %v949_v1 = vunpack.c.l.bf16 %v948_v63  ;;  %p1619_p6 = scmp.ne.s32.totalorder %s2131_s19, %s1618_s23  ;;  %p1626_p7 = scmp.lt.s32.totalorder %s1624_s29, %s1618_s23 }
  0xe9   : > { %1227 = vmatpush3.bf16.msra.mxu0 %v1418_v7  ;;  %1247 = vmatpush3.bf16.msra.mxu1 %v1419_v8  ;;  %p1620_p4 = pnand %p1619_p6, %p2226_p13  ;;  %p1627_p11 = por %p1626_p7, %p1625_p0 }
  0xea   : > { %1228 = vmatprep.subr.bf16.mxu0 %v1726_v0  ;;  %1248 = vmatprep.subr.bf16.mxu1 %v1726_v0 }
  0xeb   : > { %p1621_p9 = pneg %p1620_p4 }
  0xed   : > { %1229 = vmatpush3.bf16.msra.mxu0 %v1420_v9  ;;  %1249 = vmatpush3.bf16.msra.mxu1 %v1421_v10  ;;  %p1628_p2 = pnand %p1627_p11, %p1621_p9 }
  0xee   : > { %1230 = vmatprep.subr.bf16.mxu0 %v1726_v0  ;;  %1250 = vmatprep.subr.bf16.mxu1 %v1726_v0 }
  0xf1   : > { %1231 = vmatpush3.bf16.msra.mxu0 %v1422_v11  ;;  %1251 = vmatpush3.bf16.msra.mxu1 %v1423_v12 }
  0xf2   : > { %1232 = vmatprep.subr.bf16.mxu0 %v1726_v0  ;;  %1252 = vmatprep.subr.bf16.mxu1 %v1726_v0 }
  0xf5   : > { %1233 = vmatpush3.bf16.msra.mxu0 %v1424_v13  ;;  %1253 = vmatpush3.bf16.msra.mxu1 %v1425_v14 }
  0xf6   : > { %1234 = vmatprep.subr.bf16.mxu0 %v1726_v0  ;;  %1254 = vmatprep.subr.bf16.mxu1 %v1726_v0 }
  0xf9   : > { %1235 = vmatpush3.bf16.msra.mxu0 %v1426_v15  ;;  %1255 = vmatpush3.bf16.msra.mxu1 %v1427_v16 }
  0xfa   : > { %1260 = vmatprep.subr.bf16.mxu0 %v1726_v0  ;;  %1280 = vmatprep.subr.bf16.mxu1 %v1726_v0 }
  0xfc   : > { %1237 = vmatmul.mubr.bf16.vlgmr.msra.gmra.mrb[0].mxu0 %v507_v17  ;;  %1257 = vmatmul.mubr.bf16.vlgmr.msra.gmra.mrb[0].mxu1 %v490_v19 }
  0xfd   : > { %1261 = vmatpush3.bf16.msra.mxu0 %v1428_v18  ;;  %1276 = vmatprep.mubr.msk.bf16.mxu0 %vm1727_vm0, %v1726_v0 }
  0xfe   : > { %1262 = vmatprep.subr.bf16.mxu0 %v1726_v0  ;;  %1296 = vmatprep.mubr.msk.bf16.mxu1 %vm1727_vm0, %v1726_v0 }
  0xff   : > { %1281 = vmatpush3.bf16.msra.mxu1 %v1436_v27 }
 0x100   : > { %1282 = vmatprep.subr.bf16.mxu1 %v1726_v0 }
 0x101   : > { %1263 = vmatpush3.bf16.msra.mxu0 %v1429_v20 }
 0x102   : > { %1264 = vmatprep.subr.bf16.mxu0 %v1726_v0 }
 0x103   : > { %1283 = vmatpush3.bf16.msra.mxu1 %v1437_v28 }
 0x104   : > { %1284 = vmatprep.subr.bf16.mxu1 %v1726_v0 }
 0x105   : > { %1265 = vmatpush3.bf16.msra.mxu0 %v1430_v21 }
 0x106   : > { %1266 = vmatprep.subr.bf16.mxu0 %v1726_v0 }
 0x107   : > { %1285 = vmatpush3.bf16.msra.mxu1 %v1438_v29 }
 0x108   : > { %1286 = vmatprep.subr.bf16.mxu1 %v1726_v0 }
 0x109   : > { %1267 = vmatpush3.bf16.msra.mxu0 %v1431_v22 }
 0x10a   : > { %1268 = vmatprep.subr.bf16.mxu0 %v1726_v0 }
 0x10b   : > { %1287 = vmatpush3.bf16.msra.mxu1 %v1439_v30 }
 0x10c   : > { %1288 = vmatprep.subr.bf16.mxu1 %v1726_v0 }
 0x10d   : > { %1269 = vmatpush3.bf16.msra.mxu0 %v1432_v23 }
 0x10e   : > { %1270 = vmatprep.subr.bf16.mxu0 %v1726_v0 }
 0x10f   : > { %1289 = vmatpush3.bf16.msra.mxu1 %v1440_v31 }
 0x110   : > { %1290 = vmatprep.subr.bf16.mxu1 %v1726_v0 }
 0x111   : > { %1271 = vmatpush3.bf16.msra.mxu0 %v1433_v24 }
 0x112   : > { %1272 = vmatprep.subr.bf16.mxu0 %v1726_v0 }
 0x113   : > { %1291 = vmatpush3.bf16.msra.mxu1 %v1441_v32 }
 0x114   : > { %1292 = vmatprep.subr.bf16.mxu1 %v1726_v0 }
 0x115   : > { %1273 = vmatpush3.bf16.msra.mxu0 %v1434_v25 }
 0x116   : > { %1274 = vmatprep.subr.bf16.mxu0 %v1726_v0 }
 0x117   : > { %1293 = vmatpush3.bf16.msra.mxu1 %v1442_v47 }
 0x118   : > { %1294 = vmatprep.subr.bf16.mxu1 %v1726_v0  ;;  %v946_v0 = vld [vmem:[%s2046_s8] sm:$0xf]  ;;  %s956_s8 = scalar_lea.sflag [#allocation6], %s2042_s3 }
 0x119   : > { %1275 = vmatpush3.bf16.msra.mxu0 %v1435_v26  ;;  %v947_v2 = vunpack.c.l.bf16 %v946_v0 }
 0x11b   : > { %1295 = vmatpush3.bf16.msra.mxu1 %v1443_v48 }
 0x1cf   : > { %v606_v33 = vpop.f32.mrb[0].mxu0  ;;  %v694_v34 = vpop.f32.mrb[0].mxu1 }
 0x1d0   : > { %v1238_v36 = vpop.f32.mrb[1].mxu0  ;;  %v695_v37 = vadd.f32 %v694_v34, %v606_v33  ;;  %v1258_v38 = vpop.f32.mrb[1].mxu1 }
 0x1d1   : > { %v609_v39 = vpop.f32.mrb[2].mxu0  ;;  %v697_v40 = vpop.f32.mrb[2].mxu1 }
 0x1d2   : > { %v1239_v41 = vpop.f32.mrb[3].mxu0  ;;  %v707_v42 = vadd.f32 %v1161_v35, %v695_v37  ;;  %v1259_v43 = vpop.f32.mrb[3].mxu1 }
 0x1d4   : > { %v708_v44 = vmax.f32 %v707_v42, 0.0 }
 0x1d6   : > { %v709_v45 = vpack.c.bf16 %v708_v44, %v708_v44 }
 0x1d8   : > { %710 = vst [vmem:[#allocation2] sm:$0xf] %v709_v45 }
 0x1df   : > { %v712_v46 = vld [vmem:[#allocation2] sm:$0xf] }
 0x1e0   : > { %1277 = vmatmul.mubr.bf16.vlgmr.msra.gmra.mrb[4].mxu0 %v712_v46 }
 0x2b3   : > { %v818_v50 = vpop.f32.mrb[4].mxu0 }
 0x2b4   : > { %v819_v51 = vadd.f32 %v1162_v49, %v818_v50  ;;  %v1278_v52 = vpop.f32.mrb[5].mxu0 }
 0x2b5   : > { %v821_v53 = vpop.f32.mrb[6].mxu0 }
 0x2b6   : > { %v824_v54 = vmax.f32 %v819_v51, 0.0  ;;  %v1279_v55 = vpop.f32.mrb[7].mxu0 }
 0x2b8   : > { %v826_v56 = vpack.c.bf16 %v824_v54, %v824_v54 }
 0x2ba   : > { %1297 = vmatmul.mubr.bf16.vlgmr.msra.gmra.mrb[4].mxu1 %v826_v56 }
 0x38d   : > { %v925_v58 = vpop.f32.mrb[4].mxu1 }
 0x38e   : > { %v944_v59 = vadd.f32 %v1179_v57, %v925_v58  ;;  %v1298_v60 = vpop.f32.mrb[5].mxu1 }
 0x38f   : > { %v928_v61 = vpop.f32.mrb[6].mxu1 }
 0x390   : > { %1444 = vtanh.f32 %v944_v59  ;;  %v1299_v62 = vpop.f32.mrb[7].mxu1 }
 0x39a   : > { %v1445_v3 = vpop.eup %1444 }
 0x39b   : > { %v950_v4 = vsub.f32 1.0, %v1445_v3  ;;  %v952_v5 = vmul.f32 %v1445_v3, %v949_v1 }
 0x39d   : > { %v951_v6 = vmul.f32 %v950_v4, %v947_v2 }
 0x39f   : > { %v953_v7 = vadd.f32 %v952_v5, %v951_v6 }
 0x3a1   : > { %954 = vst [vmem:[%s480_s21] sm:$0xff] %v953_v7 }
 0x3a2   : > { %1631 = shalt.err (!%p1628_p2)
}
 0x3a3   : > { %s1632_s3 = scalar_lea.hbm %s2129_s16, 128  ;;  %s1636_s20 = scalar_lea.hbm %s2225_s9, 256 }
 0x3a4   : > { %p1633_p10 = scmp.ne.s32.totalorder %s2129_s16, %s1632_s3  ;;  %p1637_p8 = scmp.lt.u32.totalorder %s2129_s16, %s2225_s9 }
 0x3a5   : > { %p1638_p3 = scmp.lt.u32.totalorder %s1636_s20, %s1632_s3  ;;  %p1640_p6 = scmp.lt.u32.totalorder %s1632_s3, %s2129_s16 }
 0x3a6   : > { %p1634_p1 = pnand %p1633_p10, %p2226_p13 }
 0x3a7   : > { %p1639_p12 = por %p1638_p3, %p1637_p8 }
 0x3a8   : > { %p1635_p5 = pneg %p1634_p1 }
 0x3a9   : > { %p1641_p4 = por %p1640_p6, %p1639_p12 }
 0x3ab   : > { %p1642_p9 = pnand %p1641_p4, %p1635_p5 }
 0x3ad   : > { %1645 = shalt.err (!%p1642_p9)
}
 0x3ae   : > { %1320 = dma.vmem_to_hbm [thread:$0]  (%p2226_p13), %s2131_s19, 128, %s2129_s16, %s956_s8  }
 0x3af PF: > { %s981_s2 = sand.u32 1, %s1696_s30   ;;  %p2227_p0 = scmp.ne.s32.totalorder %s2213_s28, 0 }
 0x3b0   : > { %p2228_p7 = scmp.ge.s32.totalorder %s1716_s14, 2  ;;  %s982_s22 = scalar_lea.sflag [#allocation6], %s981_s2 }
 0x3b2   : > { %p1343_p11 = pnand %p2228_p7, %p2227_p0 }
 0x3b4   : > { %1691 = dma.done.wait (!%p1343_p11), %s982_s22, 128  }
 0x3b5   : > { %1693 = vsyncadd (!%p1343_p11), %s982_s22, 4294967168  ;;  %s30_s14 = sadd.s32 1, %s1716_s14   ;;  %s2229_s21 = sld [smem:[#allocation23_spill]] }
 0x3b6   : > { %p27_p2 = scmp.ge.s32.totalorder %s30_s14, 4   ;;  %s2230_s30 = smov %s1700_s10 }
 0x3b7   : > { %s2231_s10 = smov %s1704_s11  ;;  %s2232_s11 = smov %s1963_s27 }
 0x3b8   : > { %s2233_s12 = smov %s1712_s13  ;;  %29 = sbr.rel (!%p27_p2) target bundleno = 17 (0x11), region = 143 }
 0x3bb   : > { %s2234_s13 = smov %s2229_s21 }
 0x3bf   :  { %987 = vsyncpa [#allocation5], 1 }
 0x3c0   :  { %989 = vsyncpa [#allocation5 + $0x1], 1 }
 0x3c1   :  { %990 = vsyncpa [#allocation8], 1 }
 0x3c2   :  { %992 = vsyncpa [#allocation8 + $0x1], 1 }
 0x3c3   :  { %993 = vsyncpa [#allocation11], 1 }
 0x3c4   :  { %994 = vsyncpa [#allocation14], 1 }
 0x3c5   :  { %995 = vsyncpa [#allocation6], 1 }
 0x3c6   :  { %997 = vsyncpa [#allocation6 + $0x1], 1 }

</bundles_post_ra>
